<compile_context>
chip_gen: v7x
topology: tpu7x:2x2x1
jax: 0.10.0
libtpu: 0.0.40
codegen_flags: <defaults>
</compile_context>

<pallas_src>
import math

import jax
import jax.numpy as jnp
from jax.experimental import pallas as pl
from jax.experimental.pallas import tpu as pltpu


_LANE = 128
_VMEM_BUDGET = 48 * 1024 * 1024  # resident-tile cap; leaves headroom on v7x (64 MiB VMEM)


def _round_up(x: int, m: int) -> int:
    return ((x + m - 1) // m) * m


def _sublane(dtype) -> int:
    """Native sublane packing granularity for dtype: f32->8, bf16->16, int8/fp8->32."""
    return max(8, 32 // max(jnp.dtype(dtype).itemsize, 1))


def _make_kernel(has_bias: bool, use_scratch: bool):
    """Build the matmul kernel variant.

    use_scratch=False: output dtype is f32 -> accumulate directly into o_ref.
    use_scratch=True : accumulate in an f32 VMEM scratch, downcast on the last K step.
    """

    def _accumulate(x_ref, w_ref, acc):
        k = pl.program_id(2)

        @pl.when(k == 0)
        def _init():
            acc[...] = jnp.zeros_like(acc)

        acc[...] += jnp.dot(
            x_ref[...], w_ref[...], preferred_element_type=jnp.float32
        )
        return k

    if use_scratch:
        if has_bias:
            def kernel(x_ref, w_ref, b_ref, o_ref, acc_ref):
                k = _accumulate(x_ref, w_ref, acc_ref)

                @pl.when(k == pl.num_programs(2) - 1)
                def _fin():
                    o_ref[...] = (acc_ref[...] + b_ref[...]).astype(o_ref.dtype)
        else:
            def kernel(x_ref, w_ref, o_ref, acc_ref):
                k = _accumulate(x_ref, w_ref, acc_ref)

                @pl.when(k == pl.num_programs(2) - 1)
                def _fin():
                    o_ref[...] = acc_ref[...].astype(o_ref.dtype)
    else:
        if has_bias:
            def kernel(x_ref, w_ref, b_ref, o_ref):
                k = _accumulate(x_ref, w_ref, o_ref)

                @pl.when(k == pl.num_programs(2) - 1)
                def _fin():
                    o_ref[...] += b_ref[...]
        else:
            def kernel(x_ref, w_ref, o_ref):
                _accumulate(x_ref, w_ref, o_ref)

    return kernel


def prepare_linear_norm(weight, bias=None, *, tn=1024, tk=1024, tm_hint=1024,
                        mxu_dtype=None):
    """One-time weight/bias preparation.  Hoist this out of the per-step forward path.

    weight: (out_features, in_features)  -- nn.Linear layout.
    bias:   (out_features,) or None.
    mxu_dtype: e.g. jnp.bfloat16 to feed the MXU bf16 operands (f32 accumulation).
    """
    N, K = weight.shape
    w_dtype = jnp.dtype(mxu_dtype) if mxu_dtype is not None else jnp.dtype(weight.dtype)

    tn = _round_up(max(tn, _LANE), _LANE)
    tk = _round_up(max(tk, _LANE), _LANE)

    # Keep the (double-buffered) resident tile footprint under the VMEM budget,
    # assuming worst-case f32 activations / outputs plus an f32 accumulator.
    def _footprint(tn_, tk_):
        return (2 * tm_hint * tk_ * 4
                + 2 * tk_ * tn_ * w_dtype.itemsize
                + 2 * tm_hint * tn_ * 4
                + tm_hint * tn_ * 4)

    while _footprint(tn, tk) > _VMEM_BUDGET and tk > 512:
        tk //= 2
    while _footprint(tn, tk) > _VMEM_BUDGET and tn > 256:
        tn //= 2

    # Small dims use full-extent (un-padded) blocks; large dims pad to tile multiples.
    if N <= tn:
        tn, Np = N, N
    else:
        Np = _round_up(N, tn)
    if K <= tk:
        tk, Kp = K, K
    else:
        Kp = _round_up(K, tk)

    # (out, in) -> (in, out) once, so the kernel runs a canonical (M,K)x(K,N) dot.
    w = jnp.transpose(weight).astype(w_dtype)
    if (Kp, Np) != (K, N):
        w = jnp.pad(w, ((0, Kp - K), (0, Np - N)))

    b = None
    if bias is not None:
        b = jnp.pad(bias.astype(jnp.float32), (0, Np - N)).reshape(1, Np)

    return dict(w=w, b=b, in_features=K, out_features=N,
                tn=tn, tk=tk, Np=Np, Kp=Kp)


def linear_norm_apply(x, prepared, *, tm=1024):
    """y = x @ weight.T (+ bias) using the prepared (transposed/padded) weight."""
    w, b = prepared["w"], prepared["b"]
    K, N = prepared["in_features"], prepared["out_features"]
    tn, tk = prepared["tn"], prepared["tk"]
    Np, Kp = prepared["Np"], prepared["Kp"]

    *lead, Kx = x.shape
    assert Kx == K, f"x last dim {Kx} != in_features {K}"
    out_dtype = x.dtype

    x2 = x.reshape(-1, K)
    M = x2.shape[0]

    # MXU operand dtype follows the prepared weight (bf16 path halves HBM traffic
    # and hits the bf16 MXU peak on v6e/v7x); accumulation stays f32.
    if x2.dtype != w.dtype:
        x2 = x2.astype(w.dtype)

    sub = _sublane(x2.dtype)
    if M <= tm:
        tm = _round_up(M, sub)          # single block, padded only to the sublane
    else:
        tm = _round_up(tm, sub)
    Mp = tm if M <= tm else _round_up(M, tm)

    # Megacore (v7x: 2 TensorCores): keep >= 2 parallel (M, N) blocks when there
    # is enough work, so the second core is not idle.
    if Mp == tm and Np == tn and M >= 512:
        tm = _round_up((M + 1) // 2, sub)
        Mp = _round_up(M, tm)

    if (Mp, Kp) != (M, K):
        x2 = jnp.pad(x2, ((0, Mp - M), (0, Kp - K)))

    nm, nn_, nk = Mp // tm, Np // tn, Kp // tk

    has_bias = b is not None
    use_scratch = jnp.dtype(out_dtype) != jnp.dtype(jnp.float32)
    kernel = _make_kernel(has_bias, use_scratch)

    in_specs = [
        pl.BlockSpec((tm, tk), lambda i, j, k: (i, k)),   # x tile
        pl.BlockSpec((tk, tn), lambda i, j, k: (k, j)),   # weight tile (K, N)
    ]
    args = [x2, w]
    if has_bias:
        in_specs.append(pl.BlockSpec((1, tn), lambda i, j, k: (0, j)))
        args.append(b)

    scratch_shapes = [pltpu.VMEM((tm, tn), jnp.float32)] if use_scratch else []

    xb = x2.dtype.itemsize
    wb = w.dtype.itemsize
    ob = jnp.dtype(out_dtype).itemsize
    footprint = (2 * tm * tk * xb + 2 * tk * tn * wb + 2 * tm * tn * ob
                 + (tm * tn * 4 if use_scratch else 0))
    vmem_limit = min(max(footprint + (8 << 20), 32 << 20), 56 << 20)

    flops = 2 * Mp * Np * Kp
    bytes_accessed = (nn_ * Mp * Kp * xb + nm * Kp * Np * wb
                      + Mp * Np * ob + (Np * 4 if has_bias else 0))

    out = pl.pallas_call(
        kernel,
        out_shape=jax.ShapeDtypeStruct((Mp, Np), out_dtype),
        grid_spec=pltpu.PrefetchScalarGridSpec(
            num_scalar_prefetch=0,
            grid=(nm, nn_, nk),                       # K (reduction) innermost
            in_specs=in_specs,
            out_specs=pl.BlockSpec((tm, tn), lambda i, j, k: (i, j)),
            scratch_shapes=scratch_shapes,
        ),
        compiler_params=pltpu.CompilerParams(
            dimension_semantics=("parallel", "parallel", "arbitrary"),
            vmem_limit_bytes=vmem_limit,
        ),
        cost_estimate=pl.CostEstimate(
            flops=flops, transcendentals=0, bytes_accessed=bytes_accessed
        ),
    )(*args)

    if (Mp, Np) != (M, N):
        out = out[:M, :N]
    return out.reshape(*lead, N)


def linear_norm(x, weight, bias=None, *, tm=1024, tn=1024, tk=1024, mxu_dtype=None):
    """Convenience wrapper (preps the weight per call; hoist prepare_* in real use)."""
    prepared = prepare_linear_norm(weight, bias, tn=tn, tk=tk, tm_hint=tm,
                                   mxu_dtype=mxu_dtype)
    return linear_norm_apply(x, prepared, tm=tm)


def init_linear_norm_params(key, in_features, out_features, bias=False):
    """Deterministic xavier_uniform_ init, matching nn.init.xavier_uniform_."""
    bound = math.sqrt(6.0 / (in_features + out_features))
    wkey, _ = jax.random.split(key)
    weight = jax.random.uniform(
        wkey, (out_features, in_features), dtype=jnp.float32,
        minval=-bound, maxval=bound,
    )
    b = jnp.zeros((out_features,), dtype=jnp.float32) if bias else None
    return weight, b


if __name__ == "__main__":
    key = jax.random.PRNGKey(0)
    kx, kp, kx2, kp2 = jax.random.split(key, 4)

    # LinearNorm-sized example: (batch=2, seq=8, in=32, out=64), bias=False (default).
    batch, seq, in_features, out_features = 2, 8, 32, 64
    x = jax.random.normal(kx, (batch, seq, in_features), dtype=jnp.float32)
    weight, bias = init_linear_norm_params(kp, in_features, out_features, bias=False)

    prepared = prepare_linear_norm(weight, bias)          # hoisted weight prep
    y = jax.block_until_ready(linear_norm_apply(x, prepared))
    y_ref = jnp.einsum("bti,oi->bto", x, weight)
    assert y.shape == (batch, seq, out_features)
    assert jnp.allclose(y, y_ref, atol=1e-5, rtol=1e-5)

    # bias=True path (LinearNorm initializes bias to 0.0 when enabled).
    w2, b2 = init_linear_norm_params(kp, in_features, out_features, bias=True)
    y2 = jax.block_until_ready(linear_norm(x, w2, b2))
    y2_ref = jnp.einsum("bti,oi->bto", x, w2) + b2
    assert jnp.allclose(y2, y2_ref, atol=1e-5, rtol=1e-5)

    # bf16 MXU-operand path (f32 accumulation directly in the output block).
    y3 = jax.block_until_ready(linear_norm(x, weight, mxu_dtype=jnp.bfloat16))
    assert jnp.allclose(y3, y_ref, atol=5e-2, rtol=5e-2)

    # Multi-tile / padded grid path (forces nm, nn, nk > 1 with small tiles).
    M2, K2, N2 = 144, 160, 192
    xb_ = jax.random.normal(kx2, (M2, K2), dtype=jnp.float32)
    wb_, bb_ = init_linear_norm_params(kp2, K2, N2, bias=True)
    yb = jax.block_until_ready(linear_norm(xb_, wb_, bb_, tm=64, tn=128, tk=128))
    yb_ref = jnp.einsum("mk,nk->mn", xb_, wb_, precision="highest") + bb_
    assert jnp.allclose(yb, yb_ref, atol=2e-3, rtol=2e-3)

    print("KERNEL_OK")
</pallas_src>

<mosaic_0001>
module attributes {stable_mosaic.version = 11 : i64} {
  func.func @kernel(%arg0: i32, %arg1: i32, %arg2: i32, %arg3: memref<16x32xf32, #tpu.memory_space<vmem>>, %arg4: memref<32x64xf32, #tpu.memory_space<vmem>>, %arg5: memref<16x64xf32, #tpu.memory_space<vmem>>) attributes {dimension_semantics = [#tpu.dimension_semantics<parallel>, #tpu.dimension_semantics<parallel>, #tpu.dimension_semantics<arbitrary>], iteration_bounds = array<i64: 1, 1, 1>, scalar_prefetch = 0 : i64, scratch_operands = 0 : i64, tpu.core_type = #tpu.core_type<tc>, window_params = [{transform_indices = @transform_0, window_bounds = array<i64: 16, 32>}, {transform_indices = @transform_1, window_bounds = array<i64: 32, 64>}, {transform_indices = @transform_2, window_bounds = array<i64: 16, 64>}]} {
    %c0_i32 = arith.constant 0 : i32
    %0 = arith.cmpi eq, %arg2, %c0_i32 : i32
    %1 = arith.extui %0 : i1 to i32
    %c0_i32_0 = arith.constant 0 : i32
    %2 = arith.cmpi ne, %1, %c0_i32_0 : i32
    scf.if %2 {
      %cst_8 = arith.constant 0.000000e+00 : f32
      %9 = vector.broadcast %cst_8 : f32 to vector<16x64xf32>
      %c0_9 = arith.constant 0 : index
      %c0_10 = arith.constant 0 : index
      %10 = vector.load %arg5[%c0_9, %c0_10] : memref<16x64xf32, #tpu.memory_space<vmem>>, vector<16x64xf32>
      tpu.vector_store %arg5[%c0_9, %c0_10], %9 {strides = array<i32>} : memref<16x64xf32, #tpu.memory_space<vmem>>, vector<16x64xf32>,
    } else {
    }
    %c0 = arith.constant 0 : index
    %c0_1 = arith.constant 0 : index
    %3 = vector.load %arg5[%c0, %c0_1] : memref<16x64xf32, #tpu.memory_space<vmem>>, vector<16x64xf32>
    %c0_2 = arith.constant 0 : index
    %c0_3 = arith.constant 0 : index
    %4 = vector.load %arg3[%c0_2, %c0_3] : memref<16x32xf32, #tpu.memory_space<vmem>>, vector<16x32xf32>
    %c0_4 = arith.constant 0 : index
    %c0_5 = arith.constant 0 : index
    %5 = vector.load %arg4[%c0_4, %c0_5] : memref<32x64xf32, #tpu.memory_space<vmem>>, vector<32x64xf32>
    %cst = arith.constant dense<0.000000e+00> : vector<16x64xf32>
    %6 = tpu.matmul %4, %5, %cst {dimension_numbers = #tpu.dot_dimension_numbers<[1], [0], [0], [1], [0, 0, 1, 1], [], []>} : vector<16x32xf32>, vector<32x64xf32>, vector<16x64xf32> -> vector<16x64xf32>
    %7 = arith.addf %3, %6 : vector<16x64xf32>
    %c0_6 = arith.constant 0 : index
    %c0_7 = arith.constant 0 : index
    %8 = vector.load %arg5[%c0_6, %c0_7] : memref<16x64xf32, #tpu.memory_space<vmem>>, vector<16x64xf32>
    tpu.vector_store %arg5[%c0_6, %c0_7], %7 {strides = array<i32>} : memref<16x64xf32, #tpu.memory_space<vmem>>, vector<16x64xf32>,
    return
  }
  func.func @transform_0(%arg0: i32, %arg1: i32, %arg2: i32) -> (i32, i32) {
    %c0_i32 = arith.constant 0 : i32
    return %arg0, %arg2 : i32, i32
  }
  func.func @transform_1(%arg0: i32, %arg1: i32, %arg2: i32) -> (i32, i32) {
    %c0_i32 = arith.constant 0 : i32
    return %arg2, %arg1 : i32, i32
  }
  func.func @transform_2(%arg0: i32, %arg1: i32, %arg2: i32) -> (i32, i32) {
    %c0_i32 = arith.constant 0 : i32
    return %arg0, %arg1 : i32, i32
  }
}

</mosaic_0001>

<bundles_post_ra>
// kernel: tpu_custom_call.1
= control target key start
LH: loop header
LB: loop body
LE: loop exit
PB: predicated region body
PF: predicated region fallthrough
CT: control target
= control target key end

     0   :  { %7 = vsyncpa [#allocation3], 0  ;;  %s335_s0 = inlined_call_operand.hbm [shape: f32[16,32], index: 0, kind: input, shape index: {}]   ;;  %s336_s1 = inlined_call_operand.hbm [shape: f32[32,64], index: 1, kind: input, shape index: {}]   ;;  %s337_s2 = inlined_call_operand.hbm [shape: f32[16,64], index: 2, kind: output, shape index: {}]  }
   0x1   :  { %8 = vsyncpa [#allocation6], 0 }
   0x2   :  { %9 = vsyncpa [#allocation4], 0  ;;  %s265_s9 = smov [#allocation2]   ;;  %s193_s13 = scalar_lea.hbm %s335_s0, 256 }
   0x3   :  { %s15_s10 = sshll.u32 %s265_s9, 4  ;;  %p194_p0 = scmp.ne.s32.totalorder %s335_s0, %s193_s13  ;;  %s16_s10 = int_to_ptr.vmem [resolvable:$true] %s15_s10 }
   0x4   :  { %p197_p1 = scmp.lt.u32.totalorder %s193_s13, %s335_s0 }
   0x6   :  { %p199_p2 = pnand %p197_p1, %p194_p0 }
   0x8   :  { %202 = shalt.err (!%p199_p2)
}
   0x9   :  { %s203_s18 = scalar_lea.vmem %s16_s10, 256  ;;  %p208_p4 = scmp.lt.s32.totalorder %s16_s10, %s16_s10 }
   0xa   :  { %p204_p3 = scmp.ne.s32.totalorder %s16_s10, %s203_s18  ;;  %p209_p5 = scmp.lt.s32.totalorder %s203_s18, %s203_s18 }
   0xc   :  { %p210_p6 = por %p209_p5, %p208_p4 }
   0xe   :  { %p211_p7 = pnand %p210_p6, %p204_p3 }
  0x10   :  { %214 = shalt.err (!%p211_p7)
}
  0x11   :  { %s266_s19 = smov 128   ;;  %s267_s20 = smov 8  }
  0x12   :  { %21 = dma.hbm_to_vmem [thread:$0]  %s335_s0, 256, %s16_s10, [#allocation3], %s266_s19, %s266_s19, %s267_s20  }
  0x13   :  { %s268_s23 = smov [#allocation5]   ;;  %s215_s27 = scalar_lea.hbm %s336_s1, 512 }
  0x14   :  { %s27_s24 = sshll.u32 %s268_s23, 4  ;;  %p216_p8 = scmp.ne.s32.totalorder %s336_s1, %s215_s27  ;;  %s28_s24 = int_to_ptr.vmem [resolvable:$true] %s27_s24 }
  0x15   :  { %p219_p9 = scmp.lt.u32.totalorder %s215_s27, %s336_s1 }
  0x17   :  { %p221_p10 = pnand %p219_p9, %p216_p8 }
  0x19   :  { %224 = shalt.err (!%p221_p10)
}
  0x1a   :  { %s225_s4 = scalar_lea.vmem %s28_s24, 512  ;;  %p230_p12 = scmp.lt.s32.totalorder %s28_s24, %s28_s24 }
  0x1b   :  { %p226_p11 = scmp.ne.s32.totalorder %s28_s24, %s225_s4  ;;  %p231_p13 = scmp.lt.s32.totalorder %s225_s4, %s225_s4 }
  0x1d   :  { %p232_p0 = por %p231_p13, %p230_p12 }
  0x1f   :  { %p233_p1 = pnand %p232_p0, %p226_p11 }
  0x21   :  { %236 = shalt.err (!%p233_p1)
}
  0x22   :  { %33 = dma.hbm_to_vmem [thread:$0]  %s336_s1, 512, %s28_s24, [#allocation6], %s266_s19, %s266_s19, %s267_s20  }
  0x23   :  { %259 = dma.done.wait [#allocation3], 256  }
  0x24   :  { %260 = vsyncadd [#allocation3], 4294967040 }
  0x25   :  { %261 = dma.done.wait [#allocation6], 512  }
  0x26   :  { %262 = vsyncadd [#allocation6], 4294966784  ;;  %vm44_vm0 = vcmask 523264   ;;  %v269_v0 = vmov 0.0   ;;  %vm55_vm1 = vcmask 261120   ;;  %v51_v1 = vld [vmem:[#allocation5] sm:$0xff] }
  0x27   :  { %46 = vst.msk [vmem:[#allocation7 + $0x8] sm:$0xff] %vm44_vm0, %v269_v0  ;;  %45 = vst.msk [vmem:[#allocation7] sm:$0xff] %vm44_vm0, %v269_v0  ;;  %v52_v2 = vld [vmem:[#allocation5 + $0x8] sm:$0xff]  ;;  %v53_v3 = vld [vmem:[#allocation5 + $0x10] sm:$0xff]  ;;  %s270_s1 = smov [#allocation7]  }
  0x28   :  { %v179_v4 = vpack.c.bf16 %v52_v2, %v51_v1  ;;  %v54_v5 = vld [vmem:[#allocation5 + $0x18] sm:$0xff]  ;;  %v49_v6 = vld [vmem:[#allocation2] sm:$0xff]  ;;  %s147_s6 = sshll.u32 %s270_s1, 4  ;;  %s148_s6 = int_to_ptr.vmem [resolvable:$true] %s147_s6 }
  0x29   :  { %v183_v7 = vpack.c.bf16 %v54_v5, %v53_v3  ;;  %176 = vmatprep.mubr.msk.f32.mxu0 %vm55_vm1, %v49_v6  ;;  %v50_v8 = vld [vmem:[#allocation2 + $0x8] sm:$0xff]  ;;  %s237_s7 = scalar_lea.vmem %s148_s6, 256  ;;  %p242_p3 = scmp.lt.s32.totalorder %s148_s6, %s148_s6 }
  0x2a   :  { %180 = vmatprep.subr.bf16.mxu0 %v179_v4  ;;  %p238_p2 = scmp.ne.s32.totalorder %s148_s6, %s237_s7  ;;  %p243_p4 = scmp.lt.s32.totalorder %s237_s7, %s237_s7 }
  0x2b   :  { %182 = vmatpush3.bf16.msra.mxu0 %v179_v4 }
  0x2c   :  { %184 = vmatprep.subr.bf16.mxu0 %v183_v7  ;;  %p244_p5 = por %p243_p4, %p242_p3 }
  0x2e   :  { %v48_v9 = vld [vmem:[#allocation7 + $0x8] sm:$0xff]  ;;  %v47_v10 = vld [vmem:[#allocation7] sm:$0xff]  ;;  %p245_p6 = pnand %p244_p5, %p238_p2 }
  0x2f   :  { %186 = vmatpush3.bf16.msra.mxu0 %v183_v7 }
  0x32   :  { %177 = vmatmul.mubr.msk.f32.vlgmr.msra.gmra.mrb[0].mxu0 %vm55_vm1, %v50_v8 }
 0x105   :  { %v178_v11 = vpop.f32.mrb[0].mxu0 }
 0x106   :  { %v138_v12 = vadd.f32 %v178_v11, %v48_v9  ;;  %v128_v13 = vpop.f32.mrb[1].mxu0 }
 0x107   :  { %v137_v14 = vadd.f32 %v128_v13, %v47_v10 }
 0x108   :  { %141 = vst.msk [vmem:[#allocation7 + $0x8] sm:$0xff] %vm44_vm0, %v138_v12 }
 0x109   :  { %140 = vst.msk [vmem:[#allocation7] sm:$0xff] %vm44_vm0, %v137_v14 }
 0x10a   :  { %248 = shalt.err (!%p245_p6)
}
 0x10b   :  { %s249_s10 = scalar_lea.hbm %s337_s2, 256 }
 0x10c   :  { %p250_p7 = scmp.ne.s32.totalorder %s337_s2, %s249_s10  ;;  %p253_p8 = scmp.lt.u32.totalorder %s249_s10, %s337_s2 }
 0x10e   :  { %p255_p9 = pnand %p253_p8, %p250_p7 }
 0x110   :  { %258 = shalt.err (!%p255_p9)
}
 0x111   :  { %153 = dma.vmem_to_hbm [thread:$0]  %s148_s6, 256, %s337_s2, [#allocation4], %s266_s19, %s266_s19, %s267_s20  }
 0x112   :  { %263 = dma.done.wait [#allocation4], 256  }
 0x113   :  { %264 = vsyncadd [#allocation4], 4294967040 }
 0x114   :  { %157 = vsyncpa [#allocation3], 1 }
 0x115   :  { %158 = vsyncpa [#allocation6], 1 }
 0x116   :  { %159 = vsyncpa [#allocation4], 1 }

</bundles_post_ra>
